<compile_context>
chip_gen: v7x
topology: tpu7x:2x2x1
jax: 0.10.0
libtpu: 0.0.40
codegen_flags: <defaults>
</compile_context>

<pallas_src>
import jax
import jax.numpy as jnp
from jax.experimental import pallas as pl
from jax.experimental.pallas import tpu as pltpu

NEG_SLOPE = 0.01  # torch.nn.LeakyReLU default negative_slope
LANE = 128
SUBLANE = 8


def _round_up(x, m):
    return ((x + m - 1) // m) * m


def _vmem_capacity_bytes():
    """Physical VMEM per TensorCore; conservative fallback if query fails."""
    try:
        info = pltpu.get_tpu_info()
        cap = getattr(info, "vmem_capacity_bytes", None)
        if cap:
            return int(cap)
    except Exception:
        pass
    return 64 * 1024 * 1024  # v7x per-TC VMEM (safe lower bound everywhere)


def encoder_kernel(x_ref, w1_ref, b1_ref, w2_ref, b2_ref, o_ref, h_ref):
    # x_ref : (tb, D_pad)      w1_ref: (D_pad, H_pad)    b1_ref: (1, H_pad) f32
    # w2_ref: (H_pad, tn)      b2_ref: (1, tn) f32       o_ref : (tb, tn)
    # h_ref : (tb, H_pad) compute-dtype VMEM scratch (reused across j)
    j = pl.program_id(1)

    @pl.when(j == 0)
    def _():
        # Linear 1 (MXU, f32 accumulate) + bias + LeakyReLU (single VPU max).
        h = jnp.dot(x_ref[...], w1_ref[...], preferred_element_type=jnp.float32)
        h = h + b1_ref[...]
        h = jnp.maximum(h, NEG_SLOPE * h)
        # Dropout(p=0.2): eval-mode identity.
        h_ref[...] = h.astype(h_ref.dtype)  # single cast to compute dtype

    # Linear 2, N-tiled over output columns (nn == 1 when w2 is fully resident).
    z = jnp.dot(h_ref[...], w2_ref[...], preferred_element_type=jnp.float32)
    z = z + b2_ref[...]
    o_ref[...] = z.astype(o_ref.dtype)


def prepare_params(w1, b1, w2, b2, compute_dtype=jnp.bfloat16):
    """Pad & cast the weights ONCE (hoisted out of the per-call hot path).

    Weights are stored [in_features, out_features]. Zero-padding feature dims
    to multiples of 128 is mathematically exact."""
    D_in, H = w1.shape
    D_pad = _round_up(D_in, LANE)
    H_pad = _round_up(H, LANE)
    w1p = jnp.pad(w1, ((0, D_pad - D_in), (0, H_pad - H))).astype(compute_dtype)
    w2p = jnp.pad(w2, ((0, H_pad - H), (0, H_pad - H))).astype(compute_dtype)
    b1p = jnp.pad(b1.astype(jnp.float32).reshape(1, -1), ((0, 0), (0, H_pad - H)))
    b2p = jnp.pad(b2.astype(jnp.float32).reshape(1, -1), ((0, 0), (0, H_pad - H)))
    return dict(w1=w1p, b1=b1p, w2=w2p, b2=b2p,
                D_in=D_in, H=H, D_pad=D_pad, H_pad=H_pad,
                compute_dtype=jnp.dtype(compute_dtype))


def base_encoder_forward(x, params, *, tb_cap=512):
    """x: [B, D_in].  Returns z: [B, H] with x's dtype."""
    B, D_in = x.shape
    assert D_in == params["D_in"], "feature dim mismatch with prepared params"
    D_pad, H_pad, H = params["D_pad"], params["H_pad"], params["H"]
    cdt = params["compute_dtype"]
    out_dtype = x.dtype

    # Activation prep: cast to compute dtype; zero-pad feature dim only if needed.
    xp = x.astype(cdt)
    if D_pad != D_in:
        xp = jnp.pad(xp, ((0, 0), (0, D_pad - D_in)))

    # Batch tiling: no batch padding (Pallas masks the partial last block).
    # Keep >= 2 steps on the "parallel" axis so both v7x TensorCores work.
    if B >= SUBLANE:
        tb = min(tb_cap, _round_up(pl.cdiv(B, 2), SUBLANE))
    else:
        tb = B  # block equal to the full (small) batch dim is allowed
    nb = pl.cdiv(B, tb)

    # Generation-aware VMEM budget (~48 MiB on v7x, ~96 MiB on v5e/v6e).
    cdt_size = cdt.itemsize
    out_size = jnp.dtype(out_dtype).itemsize
    vmem_limit = max(32 * 1024 * 1024,
                     min(int(_vmem_capacity_bytes() * 0.75), 112 * 1024 * 1024))
    budget = int(vmem_limit * 0.9)

    # Resident / per-tile VMEM estimate.
    fixed = (D_pad * H_pad * cdt_size        # w1 resident (Buffered(1))
             + H_pad * 4                     # b1 resident (f32)
             + tb * H_pad * cdt_size         # h scratch (compute dtype)
             + 2 * tb * D_pad * cdt_size)    # x tile, double-buffered

    def total_with(tn, nbuf):
        return (fixed
                + nbuf * (H_pad * tn * cdt_size + tn * 4)  # w2/b2 tiles
                + 2 * tb * tn * out_size)                  # out tile, dbl-buf

    if total_with(H_pad, 1) <= budget:
        # w2 fully resident: no re-streaming from HBM per batch tile.
        tn, w2_buf = H_pad, pl.Buffered(1)
    else:
        per_col = 2 * (H_pad * cdt_size + 4) + 2 * tb * out_size
        tn = max(LANE, ((budget - fixed) // max(per_col, 1)) // LANE * LANE)
        tn = min(tn, H_pad)
        w2_buf = pl.Buffered(2)
    nn = pl.cdiv(H_pad, tn)

    flops = 2 * B * (D_in * H + H * H)
    bytes_accessed = int(xp.size * cdt_size
                         + params["w1"].size * cdt_size
                         + params["w2"].size * cdt_size
                         + params["b1"].size * 4 + params["b2"].size * 4
                         + B * H_pad * out_size)

    out = pl.pallas_call(
        encoder_kernel,
        out_shape=jax.ShapeDtypeStruct((B, H_pad), out_dtype),
        grid_spec=pltpu.PrefetchScalarGridSpec(
            num_scalar_prefetch=0,
            grid=(nb, nn),
            in_specs=[
                pl.BlockSpec((tb, D_pad), lambda i, j: (i, 0)),          # x tile
                pl.BlockSpec((D_pad, H_pad), lambda i, j: (0, 0),
                             pipeline_mode=pl.Buffered(1)),              # w1 resident
                pl.BlockSpec((1, H_pad), lambda i, j: (0, 0),
                             pipeline_mode=pl.Buffered(1)),              # b1 resident
                pl.BlockSpec((H_pad, tn), lambda i, j: (0, j),
                             pipeline_mode=w2_buf),                      # w2 (resident or N-tiled)
                pl.BlockSpec((1, tn), lambda i, j: (0, j),
                             pipeline_mode=w2_buf),                      # b2
            ],
            out_specs=pl.BlockSpec((tb, tn), lambda i, j: (i, j)),
            scratch_shapes=[pltpu.VMEM((tb, H_pad), cdt)],
        ),
        compiler_params=pltpu.CompilerParams(
            # Batch tiles independent -> megacore-parallel; the N axis carries
            # the h scratch (computed at j == 0) -> must stay sequential.
            dimension_semantics=("parallel", "arbitrary"),
            vmem_limit_bytes=int(vmem_limit),
        ),
        cost_estimate=pl.CostEstimate(flops=int(flops), transcendentals=0,
                                      bytes_accessed=bytes_accessed),
    )(xp, params["w1"], params["b1"], params["w2"], params["b2"])

    return out[:, :H]


def init_params(key, input_size, hidden_size, dtype=jnp.float32):
    """nn.Linear default init: U(-1/sqrt(fan_in), 1/sqrt(fan_in)).

    Weights stored [in_features, out_features] (transposed vs. torch)."""
    k1, k2, k3, k4 = jax.random.split(key, 4)
    bound1 = 1.0 / jnp.sqrt(input_size)
    bound2 = 1.0 / jnp.sqrt(hidden_size)
    w1 = jax.random.uniform(k1, (input_size, hidden_size), dtype, -bound1, bound1)
    b1 = jax.random.uniform(k2, (hidden_size,), dtype, -bound1, bound1)
    w2 = jax.random.uniform(k3, (hidden_size, hidden_size), dtype, -bound2, bound2)
    b2 = jax.random.uniform(k4, (hidden_size,), dtype, -bound2, bound2)
    return w1, b1, w2, b2


def reference_forward(x, w1, b1, w2, b2):
    h = x.astype(jnp.float32) @ w1.astype(jnp.float32) + b1.astype(jnp.float32)
    h = jnp.maximum(h, NEG_SLOPE * h)
    return h @ w2.astype(jnp.float32) + b2.astype(jnp.float32)


if __name__ == "__main__":
    key = jax.random.PRNGKey(0)
    kx, kp = jax.random.split(key)

    # Module defaults: input_size=3, hidden_size=2; odd batch exercises the
    # partial (masked) last batch block and the feature-dim padding.
    B, D_in, H = 10, 3, 2
    x = jax.random.normal(kx, (B, D_in), dtype=jnp.float32)
    w1, b1, w2, b2 = init_params(kp, D_in, H)
    z_ref = reference_forward(x, w1, b1, w2, b2)

    # Default fast path: bf16 MXU inputs, f32 accumulation.
    params_bf16 = prepare_params(w1, b1, w2, b2, compute_dtype=jnp.bfloat16)
    z = jax.block_until_ready(base_encoder_forward(x, params_bf16))
    assert z.shape == (B, H)
    assert jnp.allclose(z, z_ref, atol=5e-2, rtol=5e-2), "bf16 path mismatch"

    # Strict f32 path for an exact check against the JAX reference.
    params_f32 = prepare_params(w1, b1, w2, b2, compute_dtype=jnp.float32)
    z32 = jax.block_until_ready(base_encoder_forward(x, params_f32))
    assert z32.shape == (B, H)
    assert jnp.allclose(z32, z_ref, atol=1e-5, rtol=1e-5), "f32 path mismatch"

    print("KERNEL_OK")
</pallas_src>

<mosaic_0001>
module attributes {stable_mosaic.version = 11 : i64} {
  func.func @encoder_kernel(%arg0: i32, %arg1: i32, %arg2: memref<8x128xbf16, #tpu.memory_space<vmem>>, %arg3: memref<128x128xbf16, #tpu.memory_space<vmem>>, %arg4: memref<1x128xf32, #tpu.memory_space<vmem>>, %arg5: memref<128x128xbf16, #tpu.memory_space<vmem>>, %arg6: memref<1x128xf32, #tpu.memory_space<vmem>>, %arg7: memref<8x128xf32, #tpu.memory_space<vmem>>, %arg8: memref<8x128xbf16, #tpu.memory_space<vmem>>) attributes {dimension_semantics = [#tpu.dimension_semantics<parallel>, #tpu.dimension_semantics<arbitrary>], iteration_bounds = array<i64: 2, 1>, scalar_prefetch = 0 : i64, scratch_operands = 1 : i64, tpu.core_type = #tpu.core_type<tc>, window_params = [{transform_indices = @transform_0, window_bounds = array<i64: 8, 128>}, {pipeline_mode = #tpu.pipeline_mode<synchronous>, transform_indices = @transform_1, window_bounds = array<i64: 128, 128>}, {pipeline_mode = #tpu.pipeline_mode<synchronous>, transform_indices = @transform_2, window_bounds = array<i64: 1, 128>}, {pipeline_mode = #tpu.pipeline_mode<synchronous>, transform_indices = @transform_3, window_bounds = array<i64: 128, 128>}, {pipeline_mode = #tpu.pipeline_mode<synchronous>, transform_indices = @transform_4, window_bounds = array<i64: 1, 128>}, {transform_indices = @transform_5, window_bounds = array<i64: 8, 128>}]} {
    %c0_i32 = arith.constant 0 : i32
    %0 = arith.cmpi eq, %arg1, %c0_i32 : i32
    %1 = arith.extui %0 : i1 to i32
    %c0_i32_0 = arith.constant 0 : i32
    %2 = arith.cmpi ne, %1, %c0_i32_0 : i32
    scf.if %2 {
      %c0_8 = arith.constant 0 : index
      %c0_9 = arith.constant 0 : index
      %10 = vector.load %arg2[%c0_8, %c0_9] : memref<8x128xbf16, #tpu.memory_space<vmem>>, vector<8x128xbf16>
      %c0_10 = arith.constant 0 : index
      %c0_11 = arith.constant 0 : index
      %11 = vector.load %arg3[%c0_10, %c0_11] : memref<128x128xbf16, #tpu.memory_space<vmem>>, vector<128x128xbf16>
      %cst_12 = arith.constant dense<0.000000e+00> : vector<8x128xf32>
      %12 = tpu.matmul %10, %11, %cst_12 {dimension_numbers = #tpu.dot_dimension_numbers<[1], [0], [0], [1], [0, 0, 1, 1], [], []>} : vector<8x128xbf16>, vector<128x128xbf16>, vector<8x128xf32> -> vector<8x128xf32>
      %c0_13 = arith.constant 0 : index
      %c0_14 = arith.constant 0 : index
      %13 = vector.load %arg4[%c0_13, %c0_14] : memref<1x128xf32, #tpu.memory_space<vmem>>, vector<1x128xf32>
      %14 = vector.broadcast %13 : vector<1x128xf32> to vector<8x128xf32>
      %15 = arith.addf %12, %14 : vector<8x128xf32>
      %cst_15 = arith.constant 0.00999999977 : f32
      %16 = vector.broadcast %cst_15 : f32 to vector<8x128xf32>
      %17 = arith.mulf %16, %15 : vector<8x128xf32>
      %18 = arith.maximumf %15, %17 : vector<8x128xf32>
      %19 = arith.truncf %18 : vector<8x128xf32> to vector<8x128xbf16>
      %c0_16 = arith.constant 0 : index
      %c0_17 = arith.constant 0 : index
      %20 = vector.load %arg8[%c0_16, %c0_17] : memref<8x128xbf16, #tpu.memory_space<vmem>>, vector<8x128xbf16>
      tpu.vector_store %arg8[%c0_16, %c0_17], %19 {strides = array<i32>} : memref<8x128xbf16, #tpu.memory_space<vmem>>, vector<8x128xbf16>,
    } else {
    }
    %c0 = arith.constant 0 : index
    %c0_1 = arith.constant 0 : index
    %3 = vector.load %arg8[%c0, %c0_1] : memref<8x128xbf16, #tpu.memory_space<vmem>>, vector<8x128xbf16>
    %c0_2 = arith.constant 0 : index
    %c0_3 = arith.constant 0 : index
    %4 = vector.load %arg5[%c0_2, %c0_3] : memref<128x128xbf16, #tpu.memory_space<vmem>>, vector<128x128xbf16>
    %cst = arith.constant dense<0.000000e+00> : vector<8x128xf32>
    %5 = tpu.matmul %3, %4, %cst {dimension_numbers = #tpu.dot_dimension_numbers<[1], [0], [0], [1], [0, 0, 1, 1], [], []>} : vector<8x128xbf16>, vector<128x128xbf16>, vector<8x128xf32> -> vector<8x128xf32>
    %c0_4 = arith.constant 0 : index
    %c0_5 = arith.constant 0 : index
    %6 = vector.load %arg6[%c0_4, %c0_5] : memref<1x128xf32, #tpu.memory_space<vmem>>, vector<1x128xf32>
    %7 = vector.broadcast %6 : vector<1x128xf32> to vector<8x128xf32>
    %8 = arith.addf %5, %7 : vector<8x128xf32>
    %c0_6 = arith.constant 0 : index
    %c0_7 = arith.constant 0 : index
    %9 = vector.load %arg7[%c0_6, %c0_7] : memref<8x128xf32, #tpu.memory_space<vmem>>, vector<8x128xf32>
    tpu.vector_store %arg7[%c0_6, %c0_7], %8 {strides = array<i32>} : memref<8x128xf32, #tpu.memory_space<vmem>>, vector<8x128xf32>,
    return
  }
  func.func @transform_0(%arg0: i32, %arg1: i32) -> (i32, i32) {
    %c0_i32 = arith.constant 0 : i32
    %c0_i32_0 = arith.constant 0 : i32
    return %arg0, %c0_i32 : i32, i32
  }
  func.func @transform_1(%arg0: i32, %arg1: i32) -> (i32, i32) {
    %c0_i32 = arith.constant 0 : i32
    %c0_i32_0 = arith.constant 0 : i32
    %c0_i32_1 = arith.constant 0 : i32
    return %c0_i32, %c0_i32_0 : i32, i32
  }
  func.func @transform_2(%arg0: i32, %arg1: i32) -> (i32, i32) {
    %c0_i32 = arith.constant 0 : i32
    %c0_i32_0 = arith.constant 0 : i32
    %c0_i32_1 = arith.constant 0 : i32
    return %c0_i32, %c0_i32_0 : i32, i32
  }
  func.func @transform_3(%arg0: i32, %arg1: i32) -> (i32, i32) {
    %c0_i32 = arith.constant 0 : i32
    %c0_i32_0 = arith.constant 0 : i32
    return %c0_i32, %arg1 : i32, i32
  }
  func.func @transform_4(%arg0: i32, %arg1: i32) -> (i32, i32) {
    %c0_i32 = arith.constant 0 : i32
    %c0_i32_0 = arith.constant 0 : i32
    return %c0_i32, %arg1 : i32, i32
  }
  func.func @transform_5(%arg0: i32, %arg1: i32) -> (i32, i32) {
    %c0_i32 = arith.constant 0 : i32
    return %arg0, %arg1 : i32, i32
  }
}

</mosaic_0001>

<bundles_post_ra>
// kernel: tpu_custom_call.1
= control target key start
LH: loop header
LB: loop body
LE: loop exit
PB: predicated region body
PF: predicated region fallthrough
CT: control target
= control target key end

     0   :  { %10 = vsyncpa [#allocation4], 0  ;;  %s1334_s0 = inlined_call_operand.hbm [shape: bf16[10,128], index: 0, kind: input, shape index: {}]   ;;  %s1335_s1 = inlined_call_operand.hbm [shape: bf16[128,128], index: 1, kind: input, shape index: {}]   ;;  %s1336_s2 = inlined_call_operand.vmem [shape: f32[1,128], index: 2, kind: input, shape index: {}]   ;;  %s1337_s3 = inlined_call_operand.hbm [shape: bf16[128,128], index: 3, kind: input, shape index: {}]   ;;  %s1338_s4 = inlined_call_operand.vmem [shape: f32[1,128], index: 4, kind: input, shape index: {}]   ;;  %s1339_s5 = inlined_call_operand.hbm [shape: f32[10,128], index: 5, kind: output, shape index: {}]  }
   0x1   :  { %12 = vsyncpa [#allocation4 + $0x1], 0 }
   0x2   :  { %13 = vsyncpa [#allocation7], 0 }
   0x3   :  { %14 = vsyncpa [#allocation5], 0 }
   0x4   :  { %16 = vsyncpa [#allocation5 + $0x1], 0  ;;  %s1074_s18 = smov 0   ;;  %s1076_s19 = smov 0  }
   0x5   :  { %s1078_s20 = smov 0   ;;  %s1080_s21 = smov 0  }
   0x6   :  { %s1082_s22 = smov 0   ;;  %s1084_s23 = smov 0  }
   0x7 LB: > { %s665_s24 = sadd.s32 4294967295, %s1034_s23   ;;  %s666_s25 = sadd.s32 4294967294, %s1034_s23   ;;  %s1034_s23 = sphi %s1084_s23, %s22_s23   ;;  %s1030_s22 = sphi %s1082_s22, %s1361_s22   ;;  %s1026_s21 = sphi %s1080_s21, %s1360_s21   ;;  %s1022_s20 = sphi %s1078_s20, %s1359_s20   ;;  %s1018_s19 = sphi %s1076_s19, %s1358_s19   ;;  %s1014_s18 = sphi %s1074_s18, %s1357_s18  }
   0x8   : > { %p54_p0 = scmp.ne.s32.totalorder %s1018_s19, %s1014_s18  ;;  %p1108_p1 = scmp.eq.s32.totalorder %s665_s24, 0 }
   0x9   : > { %p1112_p2 = scmp.eq.s32.totalorder %s665_s24, 1  ;;  %p180_p3 = scmp.eq.s32.totalorder %s666_s25, 1 }
   0xa   : > { %s1344_s26 = scalar_select %p1108_p1, 1, 0 }
   0xb   : > { %p1118_p4 = por %p1108_p1, %p54_p0  ;;  %p667_p5 = scmp.ge.s32.totalorder %s1034_s23, 1 }
   0xc   : > { %p1123_p6 = por %p180_p3, %p54_p0  ;;  %p187_p7 = scmp.lt.s32.totalorder %s1034_s23, 3 }
   0xd   : > { %s1346_s28 = scalar_select %p1118_p4, 1, 0 }
   0xe   : > { %s1347_s29 = scalar_select %p1123_p6, 1, 0 }
   0xf   : > { %p1128_p8 = pnand %p667_p5, %p187_p7  ;;  %s1036_s6 = smov [#allocation6]  }
  0x10   : > { %s199_s7 = sshll.u32 %s1036_s6, 4  ;;  %s1037_s9 = smov [#allocation8]   ;;  %s1132_s7 = int_to_ptr.vmem [resolvable:$true] %s199_s7 }
  0x11   : > { %p771_p9 = pneg %p1128_p8  ;;  %s217_s10 = sshll.u32 %s1037_s9, 4  ;;  %s1143_s10 = int_to_ptr.vmem [resolvable:$true] %s217_s10 }
  0x12   : > { %s862_s13 = scalar_lea.hbm %s1335_s1, 1024 }
  0x13   : > { %p1139_p11 = pnand %p771_p9, %p1108_p1  ;;  %p863_p12 = scmp.ne.s32.totalorder %s1335_s1, %s862_s13 }
  0x14   : > { %p869_p5 = scmp.lt.u32.totalorder %s862_s13, %s1335_s1 }
  0x15   : > { %p864_p13 = pneg %p1139_p11 }
  0x17   : > { %p865_p0 = pnand %p864_p13, %p863_p12 }
  0x19   : > { %p866_p3 = pneg %p865_p0 }
  0x1b   : > { %p871_p7 = pnand %p869_p5, %p866_p3 }
  0x1d   : > { %874 = shalt.err (!%p871_p7)
}
  0x1e   : > { %s875_s24 = scalar_lea.vmem %s1132_s7, 1024  ;;  %p883_p1 = scmp.lt.s32.totalorder %s1132_s7, %s1132_s7 }
  0x1f   : > { %p876_p9 = scmp.ne.s32.totalorder %s1132_s7, %s875_s24  ;;  %p884_p12 = scmp.lt.s32.totalorder %s875_s24, %s875_s24 }
  0x21   : > { %p878_p10 = pnand %p876_p9, %p864_p13  ;;  %p885_p0 = por %p884_p12, %p883_p1 }
  0x23   : > { %p879_p6 = pneg %p878_p10 }
  0x25   : > { %p886_p4 = pnand %p885_p0, %p879_p6 }
  0x27   : > { %889 = shalt.err (!%p886_p4)
}
  0x28   : > { %s1038_s25 = smov 64   ;;  %s1039_s6 = smov 4  }
  0x29   : > { %774 = dma.hbm_to_vmem [thread:$0]  (!%p1139_p11), %s1335_s1, 1024, %s1132_s7, [#allocation7], %s1038_s25, %s1038_s25, %s1039_s6  }
  0x2a   : > { %s890_s14 = scalar_lea.hbm %s1337_s3, 1024 }
  0x2b   : > { %p891_p1 = scmp.ne.s32.totalorder %s1337_s3, %s890_s14  ;;  %p897_p10 = scmp.lt.u32.totalorder %s890_s14, %s1337_s3 }
  0x2d   : > { %p893_p4 = pnand %p891_p1, %p864_p13 }
  0x2f   : > { %p894_p6 = pneg %p893_p4 }
  0x31   : > { %p899_p3 = pnand %p897_p10, %p894_p6 }
  0x33   : > { %902 = shalt.err (!%p899_p3)
}
  0x34   : > { %s903_s7 = scalar_lea.vmem %s1143_s10, 1024  ;;  %p911_p12 = scmp.lt.s32.totalorder %s1143_s10, %s1143_s10 }
  0x35   : > { %p904_p5 = scmp.ne.s32.totalorder %s1143_s10, %s903_s7  ;;  %p912_p0 = scmp.lt.s32.totalorder %s903_s7, %s903_s7 }
  0x37   : > { %p906_p7 = pnand %p904_p5, %p864_p13  ;;  %p913_p1 = por %p912_p0, %p911_p12 }
  0x39   : > { %p907_p9 = pneg %p906_p7 }
  0x3b   : > { %p914_p4 = pnand %p913_p1, %p907_p9 }
  0x3d   : > { %917 = shalt.err (!%p914_p4)
}
  0x3e   : > { %777 = dma.hbm_to_vmem [thread:$0]  (!%p1139_p11), %s1337_s3, 1024, %s1143_s10, [#allocation7], %s1038_s25, %s1038_s25, %s1039_s6  }
  0x3f   : > { %s34_s12 = sadd.s32 1, %s1030_s22  ;;  %s41_s13 = sadd.s32 1, %s1022_s20 }
  0x40   : > { %p36_p13 = scmp.ge.s32.totalorder %s34_s12, 2  ;;  %p48_p6 = scmp.ne.s32.totalorder %s1022_s20, %s1018_s19 }
  0x41   : > { %p49_p10 = scmp.eq.s32.totalorder %s1034_s23, 0  ;;  %p788_p3 = scmp.lt.s32.totalorder %s1034_s23, 2 }
  0x42   : > { %s1363_s12 = smov (%p36_p13, %s34_s12), 0  ;;  %p1207_p7 = por %p1112_p2, %p48_p6 }
  0x43   : > { %p50_p5 = por %p49_p10, %p48_p6  ;;  %s38_s14 = ssub.s32 %s1030_s22, %s1363_s12 }
  0x44   : > { %s1350_s8 = scalar_select %p1207_p7, 1, 0 }
  0x45   : > { %s237_s15 = sand.u32 1, %s1022_s20   ;;  %p39_p9 = scmp.eq.s32.totalorder %s38_s14, 0 }
  0x46   : > { %s672_s10 = sshll.u32 %s237_s15, 2  ;;  %s673_s25 = sshll.u32 %s1030_s22, 6 }
  0x47   : > { %s1216_s6 = scalar_select %p39_p9, %s1022_s20, %s41_s13  }
  0x48   : > { %s1221_s24 = scalar_lea.hbm %s1334_s0, %s673_s25  ;;  %s241_s27 = scalar_lea.vmem [#allocation3], %s672_s10 }
  0x49   : > { %s248_s7 = sshll.u32 %s241_s27, 4  ;;  %p1225_p2 = pnand %p788_p3, %p50_p5  ;;  %s1229_s7 = int_to_ptr.vmem [resolvable:$true] %s248_s7 }
  0x4a   : > { %s238_s11 = scalar_lea.sflag [#allocation4], %s237_s15  ;;  %s918_s13 = scalar_lea.hbm %s1221_s24, 64 }
  0x4b   : > { %p919_p11 = scmp.ne.s32.totalorder %s1221_s24, %s918_s13  ;;  %p920_p12 = pneg %p1225_p2 }
  0x4c   : > { %s923_s25 = scalar_lea.hbm %s1334_s0, 128  ;;  %p924_p4 = scmp.lt.u32.totalorder %s1221_s24, %s1334_s0 }
  0x4d   : > { %p921_p0 = pnand %p920_p12, %p919_p11  ;;  %p925_p13 = scmp.lt.u32.totalorder %s923_s25, %s918_s13 }
  0x4e   : > { %p927_p10 = scmp.lt.u32.totalorder %s918_s13, %s1221_s24 }
  0x4f   : > { %p922_p1 = pneg %p921_p0  ;;  %p926_p6 = por %p925_p13, %p924_p4 }
  0x51   : > { %p928_p3 = por %p927_p10, %p926_p6 }
  0x53   : > { %p929_p5 = pnand %p928_p3, %p922_p1 }
  0x55   : > { %932 = shalt.err (!%p929_p5)
}
  0x56   : > { %s933_s15 = scalar_lea.vmem %s1229_s7, 64  ;;  %s1040_s27 = smov [#allocation3]  }
  0x57   : > { %p934_p9 = scmp.ne.s32.totalorder %s1229_s7, %s933_s15  ;;  %s938_s14 = sshll.u32 %s1040_s27, 4  ;;  %s939_s14 = int_to_ptr.vmem [resolvable:$false] %s938_s14 }
  0x58   : > { %s940_s10 = scalar_lea.vmem %s939_s14, 128  ;;  %p941_p7 = scmp.lt.s32.totalorder %s1229_s7, %s939_s14 }
  0x59   : > { %p936_p11 = pnand %p934_p9, %p920_p12  ;;  %p942_p4 = scmp.lt.s32.totalorder %s940_s10, %s933_s15 }
  0x5b   : > { %p937_p0 = pneg %p936_p11  ;;  %p943_p13 = por %p942_p4, %p941_p7 }
  0x5d   : > { %p944_p6 = pnand %p943_p13, %p937_p0 }
  0x5f   : > { %947 = shalt.err (!%p944_p6)
}
  0x60   : > { %781 = dma.hbm_to_vmem [thread:$0]  (!%p1225_p2), %s1221_s24, 64, %s1229_s7, %s238_s11  }
  0x61   : > { %257 = sbr.rel (%p1128_p8) target bundleno = 598 (0x256), region = 40  ;;  %s1259_s13 = sand.u32 (!%p1128_p8), 1, %s1018_s19  }
  0x62   : > { %s675_s25 = sshll.u32 (!%p1128_p8), %s1259_s13, 2  ;;  %s260_s16 = scalar_lea.sflag (!%p1128_p8), [#allocation4], %s1259_s13 }
  0x63   : > { %s1263_s17 = scalar_lea.vmem (!%p1128_p8), [#allocation3], %s675_s25  ;;  %p1352_p7 = scmp.ne.s32.totalorder (!%p1128_p8), %s1346_s28, 0 }
  0x68   : > { %1001 = dma.done.wait (%p1352_p7), %s260_s16, 64  }
  0x69   : > { %1003 = vsyncadd (%p1352_p7), %s260_s16, 4294967232  ;;  %p1353_p2 = scmp.ne.s32.totalorder %s1344_s26, 0 }
  0x6b   : > { %1005 = dma.done.wait (%p1353_p2), [#allocation7], 2048  }
  0x6c   : > { %1007 = vsyncadd (%p1353_p2), [#allocation7], 4294965248  ;;  %v1041_v0 = vmov 0.0   ;;  %vm1042_vm0 = vmmov 0   ;;  %v846_v1 = vld [vmem:[#allocation6] sm:$0xff]   ;;  %v847_v2 = vld [vmem:[#allocation6 + $0x8] sm:$0xff]  }
  0x6d   : > { %719 = vmatprep.subr.bf16.mxu0 %v1041_v0  ;;  %735 = vmatprep.mubr.msk.bf16.mxu0 %vm1042_vm0, %v1041_v0  ;;  %v848_v3 = vld [vmem:[#allocation6 + $0x10] sm:$0xff]   ;;  %v854_v4 = vld [vmem:[#allocation8] sm:$0xff]   ;;  %v849_v5 = vld [vmem:[#allocation6 + $0x18] sm:$0xff]   ;;  %s678_s30 = sshll.u32 %s1259_s13, 3  ;;  %s698_s9 = sshll.u32 %s1026_s21, 7 }
  0x6e   : > { %739 = vmatprep.subr.bf16.mxu1 %v1041_v0  ;;  %755 = vmatprep.mubr.msk.bf16.mxu1 %vm1042_vm0, %v1041_v0  ;;  %v855_v6 = vld [vmem:[#allocation8 + $0x8] sm:$0xff]   ;;  %v850_v7 = vld [vmem:[#allocation6 + $0x20] sm:$0xff]   ;;  %v856_v8 = vld [vmem:[#allocation8 + $0x10] sm:$0xff]   ;;  %s300_s11 = scalar_lea.vmem [#allocation9], %s678_s30  ;;  %s1285_s10 = scalar_lea.hbm %s1339_s5, %s698_s9 }
  0x6f   : > { %720 = vmatpush3.bf16.msra.mxu0 %v846_v1  ;;  %740 = vmatpush3.bf16.msra.mxu1 %v854_v4  ;;  %v851_v9 = vld [vmem:[#allocation6 + $0x28] sm:$0xff]   ;;  %v857_v10 = vld [vmem:[#allocation8 + $0x18] sm:$0xff]   ;;  %v852_v11 = vld [vmem:[#allocation6 + $0x30] sm:$0xff]   ;;  %s553_s15 = sshll.u32 %s300_s11, 4  ;;  %s539_s25 = scalar_lea.sflag [#allocation5], %s1259_s13  ;;  %s1287_s15 = int_to_ptr.vmem [resolvable:$true] %s553_s15 }
  0x70   : > { %721 = vmatprep.subr.bf16.mxu0 %v1041_v0  ;;  %741 = vmatprep.subr.bf16.mxu1 %v1041_v0  ;;  %v853_v12 = vld [vmem:[#allocation6 + $0x38] sm:$0xff]   ;;  %v858_v14 = vld [vmem:[#allocation8 + $0x20] sm:$0xff]   ;;  %v859_v15 = vld [vmem:[#allocation8 + $0x28] sm:$0xff]   ;;  %s948_s21 = scalar_lea.vmem %s1287_s15, 128  ;;  %p1354_p12 = scmp.ne.s32.totalorder %s1350_s8, 0 }
  0x71   : > { %v309_v13 = vld [vmem:[%s1263_s17] sm:$0xf]  ;;  %v860_v16 = vld [vmem:[#allocation8 + $0x30] sm:$0xff]   ;;  %p949_p8 = scmp.ne.s32.totalorder %s1287_s15, %s948_s21  ;;  %s1043_s16 = smov [#allocation9]  }
  0x72   : > { %v861_v17 = vld [vmem:[#allocation8 + $0x38] sm:$0xff]   ;;  %v679_v18 = vld [vmem:[%s1336_s2] ss:$0 sm:$0xff]  ;;  %s952_s17 = sshll.u32 %s1043_s16, 4  ;;  %s953_s17 = int_to_ptr.vmem [resolvable:$false] %s952_s17 }
  0x73   : > { %722 = vmatpush3.bf16.msra.mxu0 %v847_v2  ;;  %742 = vmatpush3.bf16.msra.mxu1 %v855_v6  ;;  %v688_v28 = vld [vmem:[%s1338_s4] ss:$0 sm:$0xff]  ;;  %p950_p1 = pnand %p949_p8, %p1354_p12  ;;  %s954_s26 = scalar_lea.vmem %s953_s17, 256 }
  0x74   : > { %723 = vmatprep.subr.bf16.mxu0 %v1041_v0  ;;  %743 = vmatprep.subr.bf16.mxu1 %v1041_v0  ;;  %p955_p3 = scmp.lt.s32.totalorder %s1287_s15, %s953_s17  ;;  %p956_p5 = scmp.lt.s32.totalorder %s954_s26, %s948_s21 }
  0x75   : > { %p951_p10 = pneg %p950_p1 }
  0x76   : > { %p957_p9 = por %p956_p5, %p955_p3 }
  0x77   : > { %724 = vmatpush3.bf16.msra.mxu0 %v848_v3  ;;  %744 = vmatpush3.bf16.msra.mxu1 %v856_v8 }
  0x78   : > { %725 = vmatprep.subr.bf16.mxu0 %v1041_v0  ;;  %745 = vmatprep.subr.bf16.mxu1 %v1041_v0  ;;  %p958_p11 = pnand %p957_p9, %p951_p10 }
  0x7b   : > { %726 = vmatpush3.bf16.msra.mxu0 %v849_v5  ;;  %746 = vmatpush3.bf16.msra.mxu1 %v857_v10 }
  0x7c   : > { %727 = vmatprep.subr.bf16.mxu0 %v1041_v0  ;;  %747 = vmatprep.subr.bf16.mxu1 %v1041_v0 }
  0x7f   : > { %728 = vmatpush3.bf16.msra.mxu0 %v850_v7  ;;  %748 = vmatpush3.bf16.msra.mxu1 %v858_v14 }
  0x80   : > { %729 = vmatprep.subr.bf16.mxu0 %v1041_v0  ;;  %749 = vmatprep.subr.bf16.mxu1 %v1041_v0 }
  0x83   : > { %730 = vmatpush3.bf16.msra.mxu0 %v851_v9  ;;  %750 = vmatpush3.bf16.msra.mxu1 %v859_v15 }
  0x84   : > { %731 = vmatprep.subr.bf16.mxu0 %v1041_v0  ;;  %751 = vmatprep.subr.bf16.mxu1 %v1041_v0 }
  0x87   : > { %732 = vmatpush3.bf16.msra.mxu0 %v852_v11  ;;  %752 = vmatpush3.bf16.msra.mxu1 %v860_v16 }
  0x88   : > { %733 = vmatprep.subr.bf16.mxu0 %v1041_v0  ;;  %753 = vmatprep.subr.bf16.mxu1 %v1041_v0 }
  0x8b   : > { %734 = vmatpush3.bf16.msra.mxu0 %v853_v12  ;;  %754 = vmatpush3.bf16.msra.mxu1 %v861_v17 }
  0x8e   : > { %736 = vmatmul.mubr.bf16.vlgmr.msra.gmra.mrb[0].mxu0 %v309_v13 }
 0x161   : > { %v415_v19 = vpop.f32.mrb[0].mxu0 }
 0x162   : > { %v416_v20 = vadd.f32 %v679_v18, %v415_v19  ;;  %v737_v21 = vpop.f32.mrb[1].mxu0 }
 0x163   : > { %v418_v22 = vpop.f32.mrb[2].mxu0 }
 0x164   : > { %v421_v23 = vmul.f32 0.01, %v416_v20  ;;  %v738_v24 = vpop.f32.mrb[3].mxu0 }
 0x166   : > { %v422_v25 = vmax.f32 %v416_v20, %v421_v23 }
 0x168   : > { %v423_v26 = vpack.c.bf16 %v422_v25, %v422_v25 }
 0x16a   : > { %424 = vst [vmem:[#allocation2] sm:$0xf] %v423_v26 }
 0x171   : > { %v425_v27 = vld [vmem:[#allocation2] sm:$0xf] }
 0x172   : > { %756 = vmatmul.mubr.bf16.vlgmr.msra.gmra.mrb[0].mxu1 %v425_v27 }
 0x245   : > { %v531_v29 = vpop.f32.mrb[0].mxu1 }
 0x246   : > { %v532_v30 = vadd.f32 %v688_v28, %v531_v29  ;;  %v757_v31 = vpop.f32.mrb[1].mxu1 }
 0x247   : > { %v534_v32 = vpop.f32.mrb[2].mxu1 }
 0x248   : > { %537 = vst [vmem:[%s300_s11] sm:$0xff] %v532_v30  ;;  %v758_v33 = vpop.f32.mrb[3].mxu1 }
 0x249   : > { %961 = shalt.err (!%p958_p11)
}
 0x24a   : > { %s962_s13 = scalar_lea.hbm %s1285_s10, 128  ;;  %s966_s24 = scalar_lea.hbm %s1339_s5, 256 }
 0x24b   : > { %p963_p0 = scmp.ne.s32.totalorder %s1285_s10, %s962_s13  ;;  %p967_p6 = scmp.lt.u32.totalorder %s1285_s10, %s1339_s5 }
 0x24c   : > { %p968_p7 = scmp.lt.u32.totalorder %s966_s24, %s962_s13  ;;  %p970_p8 = scmp.lt.u32.totalorder %s962_s13, %s1285_s10 }
 0x24d   : > { %p964_p4 = pnand %p963_p0, %p1354_p12 }
 0x24e   : > { %p969_p2 = por %p968_p7, %p967_p6 }
 0x24f   : > { %p965_p13 = pneg %p964_p4 }
 0x250   : > { %p971_p1 = por %p970_p8, %p969_p2 }
 0x252   : > { %p972_p10 = pnand %p971_p1, %p965_p13 }
 0x254   : > { %975 = shalt.err (!%p972_p10)
}
 0x255   : > { %769 = dma.vmem_to_hbm [thread:$0]  (%p1354_p12), %s1287_s15, 128, %s1285_s10, %s539_s25  }
 0x256 PF: > { %s565_s11 = sand.u32 1, %s1014_s18   ;;  %p1355_p3 = scmp.ne.s32.totalorder %s1347_s29, 0 }
 0x257   : > { %p1356_p5 = scmp.ge.s32.totalorder %s1034_s23, 2  ;;  %s566_s27 = scalar_lea.sflag [#allocation5], %s565_s11 }
 0x259   : > { %p783_p9 = pnand %p1356_p5, %p1355_p3 }
 0x25b   : > { %1009 = dma.done.wait (!%p783_p9), %s566_s27, 128  }
 0x25c   : > { %1011 = vsyncadd (!%p783_p9), %s566_s27, 4294967168  ;;  %s22_s23 = sadd.s32 1, %s1034_s23   ;;  %s1357_s18 = smov %s1018_s19 }
 0x25d   : > { %p19_p11 = scmp.ge.s32.totalorder %s22_s23, 4   ;;  %s1358_s19 = smov %s1022_s20 }
 0x25e   : > { %s1359_s20 = smov %s1216_s6  ;;  %s1360_s21 = smov %s1030_s22 }
 0x25f   : > { %s1361_s22 = smov %s1363_s12  ;;  %21 = sbr.rel (!%p19_p11) target bundleno = 7 (0x7), region = 101 }
 0x266   :  { %571 = vsyncpa [#allocation4], 1 }
 0x267   :  { %573 = vsyncpa [#allocation4 + $0x1], 1 }
 0x268   :  { %574 = vsyncpa [#allocation7], 1 }
 0x269   :  { %575 = vsyncpa [#allocation5], 1 }
 0x26a   :  { %577 = vsyncpa [#allocation5 + $0x1], 1 }

</bundles_post_ra>
